<compile_context>
chip_gen: v7x
topology: tpu7x:2x2x1
jax: 0.10.0
libtpu: 0.0.40
codegen_flags: <defaults>
</compile_context>

<pallas_src>
import jax
import jax.numpy as jnp
from jax.experimental import pallas as pl
from jax.experimental.pallas import tpu as pltpu


def _scale_mul_kernel(x_ref, s_ref, o_ref):
    # x_ref: (1, TR, C) activation tile; s_ref: (1, 1, C) per-channel scale
    # broadcast along sublanes (rows). Pure VPU elementwise multiply.
    o_ref[...] = x_ref[...] * s_ref[...]


def _pick_row_tile(hw, c, itemsize, budget_bytes=4 * 1024 * 1024):
    """Largest row tile whose (TR, C) block stays under the per-tile budget.

    ~4 MiB per tile keeps (2 input + 2 output) double-buffers well under the
    v7x default scoped-VMEM limit.  TR is a multiple of 8 unless it covers the
    full row extent (full extent is exempt from the (8,128) rule).
    """
    max_rows = max(8, budget_bytes // max(1, c * itemsize))
    if hw <= max_rows:
        return hw
    return max(8, min((max_rows // 8) * 8, 1024))


@jax.jit
def channel_scale_mul(x, s):
    """x: (N, C, H, W), s: (N, C, 1, 1) -> x * s, computed in Pallas."""
    N, C, H, W = x.shape
    hw = H * W

    # Layout plumbing: NCHW -> (N, H*W, C) lane-dense slab for the kernel.
    x_t = jnp.transpose(x, (0, 2, 3, 1)).reshape(N, hw, C)
    s_t = s.reshape(N, 1, C)

    tr = _pick_row_tile(hw, C, x.dtype.itemsize)
    grid = (N, pl.cdiv(hw, tr))

    out_t = pl.pallas_call(
        _scale_mul_kernel,
        out_shape=jax.ShapeDtypeStruct((N, hw, C), x.dtype),
        grid=grid,
        in_specs=[
            pl.BlockSpec((1, tr, C), lambda n, r: (n, r, 0)),
            # Independent of the row axis -> scale tile stays resident.
            pl.BlockSpec((1, 1, C), lambda n, r: (n, 0, 0)),
        ],
        out_specs=pl.BlockSpec((1, tr, C), lambda n, r: (n, r, 0)),
        # x_t is an intermediate of this jitted wrapper, so aliasing it into
        # the output is safe and saves an HBM allocation.
        input_output_aliases={0: 0},
        compiler_params=pltpu.CompilerParams(
            dimension_semantics=("parallel", "parallel"),
        ),
    )(x_t, s_t)

    return jnp.transpose(out_t.reshape(N, H, W, C), (0, 3, 1, 2))


if __name__ == "__main__":
    key = jax.random.PRNGKey(0)
    k1, k2 = jax.random.split(key)

    # Shapes from the original module: [1, 1632, 7, 7] * [1, 1632, 1, 1]
    N, C, H, W = 1, 1632, 7, 7
    x389 = jax.random.normal(k1, (N, C, H, W), dtype=jnp.float32)
    x394 = jax.random.normal(k2, (N, C, 1, 1), dtype=jnp.float32)

    out = channel_scale_mul(x389, x394)
    jax.block_until_ready(out)

    # Verify against plain JAX broadcast multiply
    ref = x389 * x394
    assert out.shape == (N, C, H, W)
    assert jnp.allclose(out, ref, atol=1e-6, rtol=1e-6)

    print("KERNEL_OK")
</pallas_src>

<mosaic_0001>
module attributes {stable_mosaic.version = 11 : i64} {
  func.func @_scale_mul_kernel(%arg0: i32, %arg1: i32, %arg2: memref<1x49x1632xf32, #tpu.memory_space<vmem>>, %arg3: memref<1x1x1632xf32, #tpu.memory_space<vmem>>, %arg4: memref<1x49x1632xf32, #tpu.memory_space<vmem>>) attributes {dimension_semantics = [#tpu.dimension_semantics<parallel>, #tpu.dimension_semantics<parallel>], iteration_bounds = array<i64: 1, 1>, scalar_prefetch = 0 : i64, scratch_operands = 0 : i64, tpu.core_type = #tpu.core_type<tc>, window_params = [{transform_indices = @transform_0, window_bounds = array<i64: 1, 49, 1632>}, {transform_indices = @transform_1, window_bounds = array<i64: 1, 1, 1632>}, {transform_indices = @transform_2, window_bounds = array<i64: 1, 49, 1632>}]} {
    %c0 = arith.constant 0 : index
    %c0_0 = arith.constant 0 : index
    %c0_1 = arith.constant 0 : index
    %0 = vector.load %arg2[%c0, %c0_0, %c0_1] : memref<1x49x1632xf32, #tpu.memory_space<vmem>>, vector<1x49x1632xf32>
    %c0_2 = arith.constant 0 : index
    %c0_3 = arith.constant 0 : index
    %c0_4 = arith.constant 0 : index
    %1 = vector.load %arg3[%c0_2, %c0_3, %c0_4] : memref<1x1x1632xf32, #tpu.memory_space<vmem>>, vector<1x1x1632xf32>
    %2 = vector.broadcast %1 : vector<1x1x1632xf32> to vector<1x49x1632xf32>
    %3 = arith.mulf %0, %2 : vector<1x49x1632xf32>
    %c0_5 = arith.constant 0 : index
    %c0_6 = arith.constant 0 : index
    %c0_7 = arith.constant 0 : index
    %4 = vector.load %arg4[%c0_5, %c0_6, %c0_7] : memref<1x49x1632xf32, #tpu.memory_space<vmem>>, vector<1x49x1632xf32>
    tpu.vector_store %arg4[%c0_5, %c0_6, %c0_7], %3 {strides = array<i32>} : memref<1x49x1632xf32, #tpu.memory_space<vmem>>, vector<1x49x1632xf32>,
    return
  }
  func.func @transform_0(%arg0: i32, %arg1: i32) -> (i32, i32, i32) {
    %c0_i32 = arith.constant 0 : i32
    %c0_i32_0 = arith.constant 0 : i32
    return %arg0, %arg1, %c0_i32 : i32, i32, i32
  }
  func.func @transform_1(%arg0: i32, %arg1: i32) -> (i32, i32, i32) {
    %c0_i32 = arith.constant 0 : i32
    %c0_i32_0 = arith.constant 0 : i32
    %c0_i32_1 = arith.constant 0 : i32
    return %arg0, %c0_i32, %c0_i32_0 : i32, i32, i32
  }
  func.func @transform_2(%arg0: i32, %arg1: i32) -> (i32, i32, i32) {
    %c0_i32 = arith.constant 0 : i32
    %c0_i32_0 = arith.constant 0 : i32
    return %arg0, %arg1, %c0_i32 : i32, i32, i32
  }
}

</mosaic_0001>

<bundles_post_ra>
// kernel: channel_scale_mul.1
= control target key start
LH: loop header
LB: loop body
LE: loop exit
PB: predicated region body
PF: predicated region fallthrough
CT: control target
= control target key end

     0   :  { %v106_v0 = vlaneseq  ;;  %vm274_vm0 = vcmask 785408   ;;  %vm353_vm1 = vcmask 778240   ;;  %s1060_s0 = inlined_call_operand.vmem [shape: f32[1,49,1632], index: 0, kind: input, shape index: {}, may-alias: {0,2}]   ;;  %s1061_s1 = inlined_call_operand.vmem [shape: f32[1,1,1632], index: 1, kind: input, shape index: {}]   ;;  %s1062_s2 = inlined_call_operand.vmem [shape: f32[1,49,1632], index: 2, kind: output, shape index: {}, may-alias: {0,2}]  }
   0x1   :  { %v11_v2 = vld [vmem:[%s1060_s0] sm:$0xff]  ;;  %v12_v4 = vld [vmem:[%s1060_s0 + $0x8] sm:$0xff]  ;;  %v13_v7 = vld [vmem:[%s1060_s0 + $0x10] sm:$0xff] }
   0x2   :  { %v374_v1 = vshrl.u32 %v106_v0, 7  ;;  %v102_v3 = vld [vmem:[%s1061_s1] sm:$0xff]  ;;  %v14_v9 = vld [vmem:[%s1060_s0 + $0x18] sm:$0xff]  ;;  %v16_v13 = vld [vmem:[%s1060_s0 + $0x28] sm:$0xff] }
   0x3   :  { %v15_v11 = vld [vmem:[%s1060_s0 + $0x20] sm:$0xff]  ;;  %v17_v21 = vld [vmem:[%s1060_s0 + $0x30] sm:$0xff]  ;;  %v18_v22 = vld [vmem:[%s1060_s0 + $0x38] sm:$0xff] }
   0x4   :  { %v108_v5 = vsub.s32 0, %v374_v1  ;;  %v112_v6 = vsub.s32 1, %v374_v1  ;;  %v116_v8 = vsub.s32 2, %v374_v1  ;;  %v120_v10 = vsub.s32 3, %v374_v1  ;;  %v103_v23 = vld [vmem:[%s1061_s1 + $0x8] sm:$0x1f] }
   0x5   :  { %v124_v12 = vsub.s32 4, %v374_v1  ;;  %v128_v14 = vsub.s32 5, %v374_v1  ;;  %v132_v15 = vsub.s32 6, %v374_v1  ;;  %v136_v16 = vsub.s32 7, %v374_v1  ;;  %v19_v28 = vld [vmem:[%s1060_s0 + $0x40] sm:$0xff]  ;;  %v20_v29 = vld [vmem:[%s1060_s0 + $0x48] sm:$0xff] }
   0x6   :  { %v405_v17 = vrot.slane %v102_v3, %v108_v5  ;;  %v407_v18 = vrot.slane %v102_v3, %v112_v6  ;;  %v409_v19 = vrot.slane %v102_v3, %v116_v8  ;;  %v411_v20 = vrot.slane %v102_v3, %v120_v10  ;;  %v21_v30 = vld [vmem:[%s1060_s0 + $0x50] sm:$0xff]  ;;  %v22_v31 = vld [vmem:[%s1060_s0 + $0x58] sm:$0xff]  ;;  %v24_v32 = vld [vmem:[%s1060_s0 + $0x68] sm:$0xff] }
   0x7   :  { %v422_v24 = vrot.slane %v102_v3, %v124_v12  ;;  %v424_v25 = vrot.slane %v102_v3, %v128_v14  ;;  %v426_v26 = vrot.slane %v102_v3, %v132_v15  ;;  %v428_v27 = vrot.slane %v102_v3, %v136_v16  ;;  %v25_v33 = vld [vmem:[%s1060_s0 + $0x70] sm:$0xff]  ;;  %v26_v34 = vld [vmem:[%s1060_s0 + $0x78] sm:$0xff]  ;;  %v23_v39 = vld [vmem:[%s1060_s0 + $0x60] sm:$0xff] }
   0x8   :  { %v171_v35 = vmul.f32 %v405_v17, %v11_v2  ;;  %v172_v36 = vmul.f32 %v407_v18, %v12_v4  ;;  %v173_v37 = vmul.f32 %v409_v19, %v13_v7  ;;  %v174_v38 = vmul.f32 %v411_v20, %v14_v9  ;;  %v27_v40 = vld [vmem:[%s1060_s0 + $0x80] sm:$0xff]  ;;  %v28_v41 = vld [vmem:[%s1060_s0 + $0x88] sm:$0xff]  ;;  %v29_v42 = vld [vmem:[%s1060_s0 + $0x90] sm:$0xff] }
   0x9   :  { %v175_v43 = vmul.f32 %v422_v24, %v15_v11  ;;  %v176_v44 = vmul.f32 %v424_v25, %v16_v13  ;;  %v177_v45 = vmul.f32 %v426_v26, %v17_v21  ;;  %v178_v46 = vmul.f32 %v428_v27, %v18_v22  ;;  %v30_v47 = vld [vmem:[%s1060_s0 + $0x98] sm:$0xff]  ;;  %v31_v48 = vld [vmem:[%s1060_s0 + $0xa0] sm:$0xff]  ;;  %v32_v49 = vld [vmem:[%s1060_s0 + $0xa8] sm:$0xff] }
   0xa   :  { %262 = vst [vmem:[%s1062_s2] sm:$0xff] %v171_v35  ;;  %263 = vst [vmem:[%s1062_s2 + $0x8] sm:$0xff] %v172_v36  ;;  %v492_v50 = vrot.slane %v103_v23, %v108_v5  ;;  %v494_v51 = vrot.slane %v103_v23, %v112_v6  ;;  %v496_v52 = vrot.slane %v103_v23, %v116_v8 }
   0xb   :  { %264 = vst [vmem:[%s1062_s2 + $0x10] sm:$0xff] %v173_v37  ;;  %265 = vst [vmem:[%s1062_s2 + $0x18] sm:$0xff] %v174_v38  ;;  %v498_v53 = vrot.slane %v103_v23, %v120_v10  ;;  %v521_v57 = vrot.slane %v103_v23, %v124_v12  ;;  %v184_v58 = vmul.f32 %v405_v17, %v24_v32 }
   0xc   :  { %v185_v59 = vmul.f32 %v407_v18, %v25_v33  ;;  %v186_v60 = vmul.f32 %v409_v19, %v26_v34  ;;  %v179_v0 = vmul.f32 %v492_v50, %v19_v28  ;;  %v180_v1 = vmul.f32 %v494_v51, %v20_v29 }
   0xd   :  { %v181_v2 = vmul.f32 %v496_v52, %v21_v30  ;;  %v182_v3 = vmul.f32 %v498_v53, %v22_v31  ;;  %v183_v7 = vmul.f32 %v521_v57, %v23_v39  ;;  %v187_v8 = vmul.f32 %v411_v20, %v27_v40 }
   0xe   :  { %v188_v9 = vmul.f32 %v422_v24, %v28_v41  ;;  %v189_v10 = vmul.f32 %v424_v25, %v29_v42  ;;  %v190_v14 = vmul.f32 %v426_v26, %v30_v47  ;;  %v191_v15 = vmul.f32 %v428_v27, %v31_v48 }
   0xf   :  { %v192_v16 = vmul.f32 %v492_v50, %v32_v49 }
  0x12   :  { %v33_v54 = vld [vmem:[%s1060_s0 + $0xb0] sm:$0xff]  ;;  %v34_v55 = vld [vmem:[%s1060_s0 + $0xb8] sm:$0xff]  ;;  %v35_v56 = vld [vmem:[%s1060_s0 + $0xc0] sm:$0xff] }
  0x13   :  { %266 = vst [vmem:[%s1062_s2 + $0x20] sm:$0xff] %v175_v43  ;;  %267 = vst [vmem:[%s1062_s2 + $0x28] sm:$0xff] %v176_v44  ;;  %v193_v21 = vmul.f32 %v494_v51, %v33_v54  ;;  %v194_v29 = vmul.f32 %v496_v52, %v34_v55  ;;  %v195_v30 = vmul.f32 %v498_v53, %v35_v56 }
  0x14   :  { %268 = vst [vmem:[%s1062_s2 + $0x30] sm:$0xff] %v177_v45  ;;  %269 = vst [vmem:[%s1062_s2 + $0x38] sm:$0xff] %v178_v46 }
  0x1b   :  { %v36_v61 = vld [vmem:[%s1060_s0 + $0xc8] sm:$0xff]  ;;  %v37_v62 = vld [vmem:[%s1060_s0 + $0xd0] sm:$0xff]  ;;  %v38_v63 = vld [vmem:[%s1060_s0 + $0xd8] sm:$0xff] }
  0x1c   :  { %v39_v4 = vld [vmem:[%s1060_s0 + $0xe0] sm:$0xff]  ;;  %v40_v5 = vld [vmem:[%s1060_s0 + $0xe8] sm:$0xff]  ;;  %v41_v6 = vld [vmem:[%s1060_s0 + $0xf0] sm:$0xff]  ;;  %v196_v31 = vmul.f32 %v521_v57, %v36_v61  ;;  %v197_v32 = vmul.f32 %v405_v17, %v37_v62  ;;  %v198_v36 = vmul.f32 %v407_v18, %v38_v63 }
  0x1d   :  { %276 = vst [vmem:[%s1062_s2 + $0x68] sm:$0xff] %v184_v58  ;;  %277 = vst [vmem:[%s1062_s2 + $0x70] sm:$0xff] %v185_v59  ;;  %v199_v37 = vmul.f32 %v409_v19, %v39_v4  ;;  %v200_v38 = vmul.f32 %v411_v20, %v40_v5  ;;  %v201_v39 = vmul.f32 %v422_v24, %v41_v6 }
  0x1e   :  { %278 = vst [vmem:[%s1062_s2 + $0x78] sm:$0xff] %v186_v60 }
  0x25   :  { %v42_v11 = vld [vmem:[%s1060_s0 + $0xf8] sm:$0xff]  ;;  %v43_v12 = vld [vmem:[%s1060_s0 + $0x100] sm:$0xff]  ;;  %v44_v13 = vld [vmem:[%s1060_s0 + $0x108] sm:$0xff] }
  0x26   :  { %270 = vst [vmem:[%s1062_s2 + $0x40] sm:$0xff] %v179_v0  ;;  %271 = vst [vmem:[%s1062_s2 + $0x48] sm:$0xff] %v180_v1  ;;  %v202_v43 = vmul.f32 %v424_v25, %v42_v11  ;;  %v203_v44 = vmul.f32 %v426_v26, %v43_v12  ;;  %v204_v45 = vmul.f32 %v428_v27, %v44_v13 }
  0x27   :  { %272 = vst [vmem:[%s1062_s2 + $0x50] sm:$0xff] %v181_v2  ;;  %273 = vst [vmem:[%s1062_s2 + $0x58] sm:$0xff] %v182_v3 }
  0x2e   :  { %v45_v22 = vld [vmem:[%s1060_s0 + $0x110] sm:$0xff]  ;;  %v46_v23 = vld [vmem:[%s1060_s0 + $0x118] sm:$0xff]  ;;  %v47_v28 = vld [vmem:[%s1060_s0 + $0x120] sm:$0xff] }
  0x2f   :  { %275 = vst.msk [vmem:[%s1062_s2 + $0x60] sm:$0xff] %vm274_vm0, %v183_v7  ;;  %279 = vst [vmem:[%s1062_s2 + $0x80] sm:$0xff] %v187_v8  ;;  %v205_v46 = vmul.f32 %v492_v50, %v45_v22  ;;  %v206_v54 = vmul.f32 %v494_v51, %v46_v23  ;;  %v207_v55 = vmul.f32 %v496_v52, %v47_v28 }
  0x30   :  { %280 = vst [vmem:[%s1062_s2 + $0x88] sm:$0xff] %v188_v9  ;;  %281 = vst [vmem:[%s1062_s2 + $0x90] sm:$0xff] %v189_v10 }
  0x37   :  { %v48_v33 = vld [vmem:[%s1060_s0 + $0x128] sm:$0xff]  ;;  %v49_v34 = vld [vmem:[%s1060_s0 + $0x130] sm:$0xff]  ;;  %v50_v35 = vld [vmem:[%s1060_s0 + $0x138] sm:$0xff] }
  0x38   :  { %282 = vst [vmem:[%s1062_s2 + $0x98] sm:$0xff] %v190_v14  ;;  %283 = vst [vmem:[%s1062_s2 + $0xa0] sm:$0xff] %v191_v15  ;;  %v208_v56 = vmul.f32 %v498_v53, %v48_v33  ;;  %v209_v58 = vmul.f32 %v521_v57, %v49_v34  ;;  %v210_v62 = vmul.f32 %v405_v17, %v50_v35 }
  0x39   :  { %284 = vst [vmem:[%s1062_s2 + $0xa8] sm:$0xff] %v192_v16  ;;  %285 = vst [vmem:[%s1062_s2 + $0xb0] sm:$0xff] %v193_v21 }
  0x40   :  { %v51_v40 = vld [vmem:[%s1060_s0 + $0x140] sm:$0xff]  ;;  %v52_v41 = vld [vmem:[%s1060_s0 + $0x148] sm:$0xff]  ;;  %v53_v42 = vld [vmem:[%s1060_s0 + $0x150] sm:$0xff] }
  0x41   :  { %286 = vst [vmem:[%s1062_s2 + $0xb8] sm:$0xff] %v194_v29  ;;  %287 = vst [vmem:[%s1062_s2 + $0xc0] sm:$0xff] %v195_v30  ;;  %v211_v63 = vmul.f32 %v407_v18, %v51_v40  ;;  %v212_v0 = vmul.f32 %v409_v19, %v52_v41  ;;  %v213_v1 = vmul.f32 %v411_v20, %v53_v42 }
  0x42   :  { %288 = vst.msk [vmem:[%s1062_s2 + $0xc8] sm:$0xff] %vm274_vm0, %v196_v31  ;;  %289 = vst [vmem:[%s1062_s2 + $0xd0] sm:$0xff] %v197_v32 }
  0x49   :  { %v54_v47 = vld [vmem:[%s1060_s0 + $0x158] sm:$0xff]  ;;  %v55_v48 = vld [vmem:[%s1060_s0 + $0x160] sm:$0xff]  ;;  %v56_v49 = vld [vmem:[%s1060_s0 + $0x168] sm:$0xff] }
  0x4a   :  { %290 = vst [vmem:[%s1062_s2 + $0xd8] sm:$0xff] %v198_v36  ;;  %291 = vst [vmem:[%s1062_s2 + $0xe0] sm:$0xff] %v199_v37  ;;  %v214_v5 = vmul.f32 %v422_v24, %v54_v47  ;;  %v215_v6 = vmul.f32 %v424_v25, %v55_v48  ;;  %v216_v7 = vmul.f32 %v426_v26, %v56_v49 }
  0x4b   :  { %292 = vst [vmem:[%s1062_s2 + $0xe8] sm:$0xff] %v200_v38  ;;  %293 = vst [vmem:[%s1062_s2 + $0xf0] sm:$0xff] %v201_v39 }
  0x52   :  { %v57_v59 = vld [vmem:[%s1060_s0 + $0x170] sm:$0xff]  ;;  %v58_v60 = vld [vmem:[%s1060_s0 + $0x178] sm:$0xff]  ;;  %v59_v61 = vld [vmem:[%s1060_s0 + $0x180] sm:$0xff] }
  0x53   :  { %294 = vst [vmem:[%s1062_s2 + $0xf8] sm:$0xff] %v202_v43  ;;  %295 = vst [vmem:[%s1062_s2 + $0x100] sm:$0xff] %v203_v44  ;;  %v217_v8 = vmul.f32 %v428_v27, %v57_v59  ;;  %v218_v12 = vmul.f32 %v492_v50, %v58_v60  ;;  %v219_v13 = vmul.f32 %v494_v51, %v59_v61 }
  0x54   :  { %296 = vst [vmem:[%s1062_s2 + $0x108] sm:$0xff] %v204_v45  ;;  %297 = vst [vmem:[%s1062_s2 + $0x110] sm:$0xff] %v205_v46 }
  0x5b   :  { %v60_v2 = vld [vmem:[%s1060_s0 + $0x188] sm:$0xff]  ;;  %v61_v3 = vld [vmem:[%s1060_s0 + $0x190] sm:$0xff]  ;;  %v62_v4 = vld [vmem:[%s1060_s0 + $0x198] sm:$0xff] }
  0x5c   :  { %298 = vst [vmem:[%s1062_s2 + $0x118] sm:$0xff] %v206_v54  ;;  %299 = vst [vmem:[%s1062_s2 + $0x120] sm:$0xff] %v207_v55  ;;  %v220_v14 = vmul.f32 %v496_v52, %v60_v2  ;;  %v221_v15 = vmul.f32 %v498_v53, %v61_v3  ;;  %v222_v23 = vmul.f32 %v521_v57, %v62_v4 }
  0x5d   :  { %300 = vst [vmem:[%s1062_s2 + $0x128] sm:$0xff] %v208_v56  ;;  %301 = vst.msk [vmem:[%s1062_s2 + $0x130] sm:$0xff] %vm274_vm0, %v209_v58 }
  0x64   :  { %v63_v9 = vld [vmem:[%s1060_s0 + $0x1a0] sm:$0xff]  ;;  %v64_v10 = vld [vmem:[%s1060_s0 + $0x1a8] sm:$0xff]  ;;  %v65_v11 = vld [vmem:[%s1060_s0 + $0x1b0] sm:$0xff] }
  0x65   :  { %302 = vst [vmem:[%s1062_s2 + $0x138] sm:$0xff] %v210_v62  ;;  %303 = vst [vmem:[%s1062_s2 + $0x140] sm:$0xff] %v211_v63  ;;  %v223_v28 = vmul.f32 %v405_v17, %v63_v9  ;;  %v224_v29 = vmul.f32 %v407_v18, %v64_v10  ;;  %v225_v30 = vmul.f32 %v409_v19, %v65_v11 }
  0x66   :  { %304 = vst [vmem:[%s1062_s2 + $0x148] sm:$0xff] %v212_v0  ;;  %305 = vst [vmem:[%s1062_s2 + $0x150] sm:$0xff] %v213_v1 }
  0x6d   :  { %v66_v16 = vld [vmem:[%s1060_s0 + $0x1b8] sm:$0xff]  ;;  %v67_v21 = vld [vmem:[%s1060_s0 + $0x1c0] sm:$0xff]  ;;  %v68_v22 = vld [vmem:[%s1060_s0 + $0x1c8] sm:$0xff] }
  0x6e   :  { %306 = vst [vmem:[%s1062_s2 + $0x158] sm:$0xff] %v214_v5  ;;  %307 = vst [vmem:[%s1062_s2 + $0x160] sm:$0xff] %v215_v6  ;;  %v226_v34 = vmul.f32 %v411_v20, %v66_v16  ;;  %v227_v35 = vmul.f32 %v422_v24, %v67_v21  ;;  %v228_v36 = vmul.f32 %v424_v25, %v68_v22 }
  0x6f   :  { %308 = vst [vmem:[%s1062_s2 + $0x168] sm:$0xff] %v216_v7  ;;  %309 = vst [vmem:[%s1062_s2 + $0x170] sm:$0xff] %v217_v8 }
  0x76   :  { %v69_v31 = vld [vmem:[%s1060_s0 + $0x1d0] sm:$0xff]  ;;  %v70_v32 = vld [vmem:[%s1060_s0 + $0x1d8] sm:$0xff]  ;;  %v71_v33 = vld [vmem:[%s1060_s0 + $0x1e0] sm:$0xff] }
  0x77   :  { %310 = vst [vmem:[%s1062_s2 + $0x178] sm:$0xff] %v218_v12  ;;  %311 = vst [vmem:[%s1062_s2 + $0x180] sm:$0xff] %v219_v13  ;;  %v229_v37 = vmul.f32 %v426_v26, %v69_v31  ;;  %v230_v41 = vmul.f32 %v428_v27, %v70_v32  ;;  %v231_v42 = vmul.f32 %v492_v50, %v71_v33 }
  0x78   :  { %312 = vst [vmem:[%s1062_s2 + $0x188] sm:$0xff] %v220_v14  ;;  %313 = vst [vmem:[%s1062_s2 + $0x190] sm:$0xff] %v221_v15 }
  0x7f   :  { %v72_v38 = vld [vmem:[%s1060_s0 + $0x1e8] sm:$0xff]  ;;  %v73_v39 = vld [vmem:[%s1060_s0 + $0x1f0] sm:$0xff]  ;;  %v74_v40 = vld [vmem:[%s1060_s0 + $0x1f8] sm:$0xff] }
  0x80   :  { %314 = vst.msk [vmem:[%s1062_s2 + $0x198] sm:$0xff] %vm274_vm0, %v222_v23  ;;  %315 = vst [vmem:[%s1062_s2 + $0x1a0] sm:$0xff] %v223_v28  ;;  %v232_v43 = vmul.f32 %v494_v51, %v72_v38  ;;  %v233_v44 = vmul.f32 %v496_v52, %v73_v39  ;;  %v234_v48 = vmul.f32 %v498_v53, %v74_v40 }
  0x81   :  { %316 = vst [vmem:[%s1062_s2 + $0x1a8] sm:$0xff] %v224_v29  ;;  %317 = vst [vmem:[%s1062_s2 + $0x1b0] sm:$0xff] %v225_v30 }
  0x88   :  { %v75_v45 = vld [vmem:[%s1060_s0 + $0x200] sm:$0xff]  ;;  %v76_v46 = vld [vmem:[%s1060_s0 + $0x208] sm:$0xff]  ;;  %v77_v47 = vld [vmem:[%s1060_s0 + $0x210] sm:$0xff] }
  0x89   :  { %318 = vst [vmem:[%s1062_s2 + $0x1b8] sm:$0xff] %v226_v34  ;;  %319 = vst [vmem:[%s1062_s2 + $0x1c0] sm:$0xff] %v227_v35  ;;  %v235_v49 = vmul.f32 %v521_v57, %v75_v45  ;;  %v236_v54 = vmul.f32 %v405_v17, %v76_v46  ;;  %v237_v55 = vmul.f32 %v407_v18, %v77_v47 }
  0x8a   :  { %320 = vst [vmem:[%s1062_s2 + $0x1c8] sm:$0xff] %v228_v36  ;;  %321 = vst [vmem:[%s1062_s2 + $0x1d0] sm:$0xff] %v229_v37 }
  0x91   :  { %v78_v56 = vld [vmem:[%s1060_s0 + $0x218] sm:$0xff]  ;;  %v79_v58 = vld [vmem:[%s1060_s0 + $0x220] sm:$0xff]  ;;  %v80_v59 = vld [vmem:[%s1060_s0 + $0x228] sm:$0xff] }
  0x92   :  { %322 = vst [vmem:[%s1062_s2 + $0x1d8] sm:$0xff] %v230_v41  ;;  %323 = vst [vmem:[%s1062_s2 + $0x1e0] sm:$0xff] %v231_v42  ;;  %v238_v60 = vmul.f32 %v409_v19, %v78_v56  ;;  %v239_v61 = vmul.f32 %v411_v20, %v79_v58  ;;  %v240_v62 = vmul.f32 %v422_v24, %v80_v59 }
  0x93   :  { %324 = vst [vmem:[%s1062_s2 + $0x1e8] sm:$0xff] %v232_v43  ;;  %325 = vst [vmem:[%s1062_s2 + $0x1f0] sm:$0xff] %v233_v44 }
  0x9a   :  { %v81_v63 = vld [vmem:[%s1060_s0 + $0x230] sm:$0xff]  ;;  %v82_v0 = vld [vmem:[%s1060_s0 + $0x238] sm:$0xff]  ;;  %v83_v1 = vld [vmem:[%s1060_s0 + $0x240] sm:$0xff] }
  0x9b   :  { %326 = vst [vmem:[%s1062_s2 + $0x1f8] sm:$0xff] %v234_v48  ;;  %327 = vst.msk [vmem:[%s1062_s2 + $0x200] sm:$0xff] %vm274_vm0, %v235_v49  ;;  %v241_v2 = vmul.f32 %v424_v25, %v81_v63  ;;  %v242_v3 = vmul.f32 %v426_v26, %v82_v0  ;;  %v243_v4 = vmul.f32 %v428_v27, %v83_v1 }
  0x9c   :  { %328 = vst [vmem:[%s1062_s2 + $0x208] sm:$0xff] %v236_v54  ;;  %329 = vst [vmem:[%s1062_s2 + $0x210] sm:$0xff] %v237_v55 }
  0xa3   :  { %v84_v5 = vld [vmem:[%s1060_s0 + $0x248] sm:$0xff]  ;;  %v85_v6 = vld [vmem:[%s1060_s0 + $0x250] sm:$0xff]  ;;  %v86_v7 = vld [vmem:[%s1060_s0 + $0x258] sm:$0xff] }
  0xa4   :  { %330 = vst [vmem:[%s1062_s2 + $0x218] sm:$0xff] %v238_v60  ;;  %331 = vst [vmem:[%s1062_s2 + $0x220] sm:$0xff] %v239_v61  ;;  %v244_v8 = vmul.f32 %v492_v50, %v84_v5  ;;  %v245_v9 = vmul.f32 %v494_v51, %v85_v6  ;;  %v246_v10 = vmul.f32 %v496_v52, %v86_v7 }
  0xa5   :  { %332 = vst [vmem:[%s1062_s2 + $0x228] sm:$0xff] %v240_v62 }
  0xac   :  { %v87_v11 = vld [vmem:[%s1060_s0 + $0x260] sm:$0xff]  ;;  %v88_v12 = vld [vmem:[%s1060_s0 + $0x268] sm:$0xff]  ;;  %v89_v13 = vld [vmem:[%s1060_s0 + $0x270] sm:$0x1] }
  0xad   :  { %333 = vst [vmem:[%s1062_s2 + $0x230] sm:$0xff] %v241_v2  ;;  %334 = vst [vmem:[%s1062_s2 + $0x238] sm:$0xff] %v242_v3  ;;  %v247_v14 = vmul.f32 %v498_v53, %v87_v11  ;;  %v248_v15 = vmul.f32 %v521_v57, %v88_v12  ;;  %v249_v16 = vmul.f32 %v405_v17, %v89_v13 }
  0xae   :  { %335 = vst [vmem:[%s1062_s2 + $0x240] sm:$0xff] %v243_v4 }
  0xb5   :  { %v90_v21 = vld [vmem:[%s1060_s0 + $0x278] sm:$0x1]  ;;  %v91_v22 = vld [vmem:[%s1060_s0 + $0x280] sm:$0x1]  ;;  %v92_v23 = vld [vmem:[%s1060_s0 + $0x288] sm:$0x1] }
  0xb6   :  { %336 = vst [vmem:[%s1062_s2 + $0x248] sm:$0xff] %v244_v8  ;;  %337 = vst [vmem:[%s1062_s2 + $0x250] sm:$0xff] %v245_v9  ;;  %v250_v17 = vmul.f32 %v407_v18, %v90_v21  ;;  %v251_v28 = vmul.f32 %v409_v19, %v91_v22  ;;  %v252_v29 = vmul.f32 %v411_v20, %v92_v23 }
  0xb7   :  { %338 = vst [vmem:[%s1062_s2 + $0x258] sm:$0xff] %v246_v10 }
  0xbe   :  { %v93_v30 = vld [vmem:[%s1060_s0 + $0x290] sm:$0x1]  ;;  %v94_v31 = vld [vmem:[%s1060_s0 + $0x298] sm:$0x1]  ;;  %v95_v32 = vld [vmem:[%s1060_s0 + $0x2a0] sm:$0x1] }
  0xbf   :  { %339 = vst [vmem:[%s1062_s2 + $0x260] sm:$0xff] %v247_v14  ;;  %340 = vst.msk [vmem:[%s1062_s2 + $0x268] sm:$0xff] %vm274_vm0, %v248_v15  ;;  %v253_v18 = vmul.f32 %v422_v24, %v93_v30  ;;  %v254_v19 = vmul.f32 %v424_v25, %v94_v31  ;;  %v255_v20 = vmul.f32 %v426_v26, %v95_v32 }
  0xc0   :  { %341 = vst [vmem:[%s1062_s2 + $0x270] sm:$0x1] %v249_v16 }
  0xc7   :  { %v96_v33 = vld [vmem:[%s1060_s0 + $0x2a8] sm:$0x1]  ;;  %v97_v34 = vld [vmem:[%s1060_s0 + $0x2b0] sm:$0x1]  ;;  %v98_v35 = vld [vmem:[%s1060_s0 + $0x2b8] sm:$0x1] }
  0xc8   :  { %342 = vst [vmem:[%s1062_s2 + $0x278] sm:$0x1] %v250_v17  ;;  %343 = vst [vmem:[%s1062_s2 + $0x280] sm:$0x1] %v251_v28  ;;  %v256_v24 = vmul.f32 %v428_v27, %v96_v33  ;;  %v257_v25 = vmul.f32 %v492_v50, %v97_v34  ;;  %v258_v26 = vmul.f32 %v494_v51, %v98_v35 }
  0xc9   :  { %344 = vst [vmem:[%s1062_s2 + $0x288] sm:$0x1] %v252_v29 }
  0xd0   :  { %v99_v36 = vld [vmem:[%s1060_s0 + $0x2c0] sm:$0x1]  ;;  %v100_v37 = vld [vmem:[%s1060_s0 + $0x2c8] sm:$0x1]  ;;  %v101_v38 = vld [vmem:[%s1060_s0 + $0x2d0] sm:$0x1] }
  0xd1   :  { %345 = vst [vmem:[%s1062_s2 + $0x290] sm:$0x1] %v253_v18  ;;  %346 = vst [vmem:[%s1062_s2 + $0x298] sm:$0x1] %v254_v19  ;;  %v259_v27 = vmul.f32 %v496_v52, %v99_v36  ;;  %v260_v50 = vmul.f32 %v498_v53, %v100_v37  ;;  %v261_v51 = vmul.f32 %v521_v57, %v101_v38 }
  0xd2   :  { %347 = vst [vmem:[%s1062_s2 + $0x2a0] sm:$0x1] %v255_v20  ;;  %348 = vst [vmem:[%s1062_s2 + $0x2a8] sm:$0x1] %v256_v24 }
  0xd3   :  { %349 = vst [vmem:[%s1062_s2 + $0x2b0] sm:$0x1] %v257_v25  ;;  %350 = vst [vmem:[%s1062_s2 + $0x2b8] sm:$0x1] %v258_v26 }
  0xd4   :  { %351 = vst [vmem:[%s1062_s2 + $0x2c0] sm:$0x1] %v259_v27  ;;  %352 = vst [vmem:[%s1062_s2 + $0x2c8] sm:$0x1] %v260_v50 }
  0xd5   :  { %354 = vst.msk [vmem:[%s1062_s2 + $0x2d0] sm:$0x1] %vm353_vm1, %v261_v51 }

</bundles_post_ra>
